<compile_context>
chip_gen: v7x
topology: tpu7x:2x2x1
jax: 0.10.0
libtpu: 0.0.40
codegen_flags: <defaults>
</compile_context>

<pallas_src>
import jax
import jax.numpy as jnp
from jax.experimental import pallas as pl
from jax.experimental.pallas import tpu as pltpu


def cf_encoder_kernel(x_ref, w1_ref, b1_ref, w2_ref, b2_ref, g_ref, beta_ref,
                      out_ref):
    # ---- Layer 1: Linear(E -> 128) + ReLU ----------------------------------
    # x arrives as f32; cast to bf16 here (free VPU op) and accumulate in f32
    # on the MXU via preferred_element_type.
    x = x_ref[...].astype(jnp.bfloat16)
    h = jnp.dot(x, w1_ref[...], preferred_element_type=jnp.float32)
    h = h + b1_ref[...]
    h = jnp.maximum(h, 0.0)
    # Dropout(0.3): identity in eval-mode forward (inverted dropout -> no-op).

    # ---- Layer 2: Linear(128 -> d_model) -----------------------------------
    y = jnp.dot(h.astype(jnp.bfloat16), w2_ref[...],
                preferred_element_type=jnp.float32)
    y = y + b2_ref[...]

    # ---- LayerNorm(d_model, eps=1e-6), f32 math, row-local -----------------
    mu = jnp.mean(y, axis=-1, keepdims=True)
    yc = y - mu
    var = jnp.mean(yc * yc, axis=-1, keepdims=True)
    inv = jax.lax.rsqrt(var + 1e-6)
    out_ref[...] = ((yc * inv) * g_ref[...] + beta_ref[...]).astype(out_ref.dtype)


def _round_up(v, m):
    return ((v + m - 1) // m) * m


def cf_encoder(x, params, *, tile_n=512, out_dtype=jnp.float32):
    """x: (N, E) float32.  params: bf16 weights + f32 bias/LN row-vectors."""
    w1, b1, w2, b2, gamma, beta = params
    n, e = x.shape
    d_model = w2.shape[1]

    # Cap the tile so (a) the grid has >= 2 steps (v7x megacore balance) and
    # (b) the sublane dim stays a multiple of 8.  The final block may be
    # partial; its OOB rows are row-local garbage and never stored.
    tile = min(tile_n, max(8, _round_up(pl.cdiv(n, 2), 8)))
    tile = min(tile, _round_up(n, 8))
    num_tiles = pl.cdiv(n, tile)

    def const_spec(shape):
        # Whole (small) array, VMEM-resident for every grid step.
        return pl.BlockSpec(shape, lambda i: tuple(0 for _ in shape))

    out = pl.pallas_call(
        cf_encoder_kernel,
        out_shape=jax.ShapeDtypeStruct((n, d_model), out_dtype),
        grid_spec=pltpu.PrefetchScalarGridSpec(
            num_scalar_prefetch=0,
            grid=(num_tiles,),
            in_specs=[
                pl.BlockSpec((tile, e), lambda i: (i, 0)),     # x tile (f32)
                const_spec(w1.shape), const_spec(b1.shape),
                const_spec(w2.shape), const_spec(b2.shape),
                const_spec(gamma.shape), const_spec(beta.shape),
            ],
            out_specs=pl.BlockSpec((tile, d_model), lambda i: (i, 0)),
        ),
        compiler_params=pltpu.CompilerParams(
            dimension_semantics=("parallel",),
            vmem_limit_bytes=32 << 20,
        ),
    )(x, w1, b1, w2, b2, gamma, beta)

    return out


def make_params(key, embedding_dim, d_model):
    """Deterministic synthetic parameters matching the PyTorch module shapes.

    Returns (kernel_params_bf16, reference_params_f32)."""
    k1, k2, k3, k4, k5 = jax.random.split(key, 5)
    w1 = jax.random.normal(k1, (embedding_dim, 128), jnp.float32) * 0.05
    b1 = jax.random.normal(k2, (128,), jnp.float32) * 0.05
    w2 = jax.random.normal(k3, (128, d_model), jnp.float32) * 0.05
    b2 = jax.random.normal(k4, (d_model,), jnp.float32) * 0.05
    gamma = 1.0 + 0.1 * jax.random.normal(k5, (d_model,), jnp.float32)
    beta = 0.01 * jnp.arange(d_model, dtype=jnp.float32)

    kernel_params = (
        w1.astype(jnp.bfloat16), b1[None, :],
        w2.astype(jnp.bfloat16), b2[None, :],
        gamma[None, :], beta[None, :],
    )
    ref_params = (w1, b1, w2, b2, gamma, beta)
    return kernel_params, ref_params


def cf_encoder_ref(x, ref_params):
    """Pure-JAX f32 reference for correctness checking (Dropout = identity)."""
    w1, b1, w2, b2, gamma, beta = ref_params
    h = jnp.maximum(jnp.dot(x, w1) + b1, 0.0)
    y = jnp.dot(h, w2) + b2
    mu = jnp.mean(y, axis=-1, keepdims=True)
    var = jnp.mean((y - mu) ** 2, axis=-1, keepdims=True)
    return (y - mu) / jnp.sqrt(var + 1e-6) * gamma + beta


if __name__ == "__main__":
    key = jax.random.PRNGKey(0)
    k_x, k_p = jax.random.split(key)

    # Small shapes; N not a multiple of the tile -> exercises the masked
    # partial output block, and N>tile -> 2 grid steps (v7x both-TC path).
    N = 200
    EMBEDDING_DIM = 64
    D_MODEL = 256      # multiple of 128 -> lane-dense (unmasked) output stores

    x = jax.random.normal(k_x, (N, EMBEDDING_DIM), jnp.float32)
    kernel_params, ref_params = make_params(k_p, EMBEDDING_DIM, D_MODEL)

    out = cf_encoder(x, kernel_params)
    out = jax.block_until_ready(out)

    ref = cf_encoder_ref(x, ref_params)
    assert out.shape == (N, D_MODEL)
    # bf16 matmuls vs f32 reference -> loosened tolerance.
    assert jnp.max(jnp.abs(out - ref)) < 5e-2

    print("KERNEL_OK")
</pallas_src>

<mosaic_0001>
module attributes {stable_mosaic.version = 11 : i64} {
  func.func @cf_encoder_kernel(%arg0: i32, %arg1: memref<104x64xf32, #tpu.memory_space<vmem>>, %arg2: memref<64x128xbf16, #tpu.memory_space<vmem>>, %arg3: memref<1x128xf32, #tpu.memory_space<vmem>>, %arg4: memref<128x256xbf16, #tpu.memory_space<vmem>>, %arg5: memref<1x256xf32, #tpu.memory_space<vmem>>, %arg6: memref<1x256xf32, #tpu.memory_space<vmem>>, %arg7: memref<1x256xf32, #tpu.memory_space<vmem>>, %arg8: memref<104x256xf32, #tpu.memory_space<vmem>>) attributes {dimension_semantics = [#tpu.dimension_semantics<parallel>], iteration_bounds = array<i64: 2>, scalar_prefetch = 0 : i64, scratch_operands = 0 : i64, tpu.core_type = #tpu.core_type<tc>, window_params = [{transform_indices = @transform_0, window_bounds = array<i64: 104, 64>}, {pipeline_mode = #tpu.pipeline_mode<synchronous>, transform_indices = @transform_1, window_bounds = array<i64: 64, 128>}, {pipeline_mode = #tpu.pipeline_mode<synchronous>, transform_indices = @transform_2, window_bounds = array<i64: 1, 128>}, {pipeline_mode = #tpu.pipeline_mode<synchronous>, transform_indices = @transform_3, window_bounds = array<i64: 128, 256>}, {pipeline_mode = #tpu.pipeline_mode<synchronous>, transform_indices = @transform_4, window_bounds = array<i64: 1, 256>}, {pipeline_mode = #tpu.pipeline_mode<synchronous>, transform_indices = @transform_5, window_bounds = array<i64: 1, 256>}, {pipeline_mode = #tpu.pipeline_mode<synchronous>, transform_indices = @transform_6, window_bounds = array<i64: 1, 256>}, {transform_indices = @transform_7, window_bounds = array<i64: 104, 256>}]} {
    %c0 = arith.constant 0 : index
    %c0_0 = arith.constant 0 : index
    %0 = vector.load %arg1[%c0, %c0_0] : memref<104x64xf32, #tpu.memory_space<vmem>>, vector<104x64xf32>
    %1 = arith.truncf %0 : vector<104x64xf32> to vector<104x64xbf16>
    %c0_1 = arith.constant 0 : index
    %c0_2 = arith.constant 0 : index
    %2 = vector.load %arg2[%c0_1, %c0_2] : memref<64x128xbf16, #tpu.memory_space<vmem>>, vector<64x128xbf16>
    %cst = arith.constant dense<0.000000e+00> : vector<104x128xf32>
    %3 = tpu.matmul %1, %2, %cst {dimension_numbers = #tpu.dot_dimension_numbers<[1], [0], [0], [1], [0, 0, 1, 1], [], []>} : vector<104x64xbf16>, vector<64x128xbf16>, vector<104x128xf32> -> vector<104x128xf32>
    %c0_3 = arith.constant 0 : index
    %c0_4 = arith.constant 0 : index
    %4 = vector.load %arg3[%c0_3, %c0_4] : memref<1x128xf32, #tpu.memory_space<vmem>>, vector<1x128xf32>
    %5 = vector.broadcast %4 : vector<1x128xf32> to vector<104x128xf32>
    %6 = arith.addf %3, %5 : vector<104x128xf32>
    %cst_5 = arith.constant 0.000000e+00 : f32
    %7 = vector.broadcast %cst_5 : f32 to vector<104x128xf32>
    %8 = arith.maximumf %6, %7 : vector<104x128xf32>
    %9 = arith.truncf %8 : vector<104x128xf32> to vector<104x128xbf16>
    %c0_6 = arith.constant 0 : index
    %c0_7 = arith.constant 0 : index
    %10 = vector.load %arg4[%c0_6, %c0_7] : memref<128x256xbf16, #tpu.memory_space<vmem>>, vector<128x256xbf16>
    %cst_8 = arith.constant dense<0.000000e+00> : vector<104x256xf32>
    %11 = tpu.matmul %9, %10, %cst_8 {dimension_numbers = #tpu.dot_dimension_numbers<[1], [0], [0], [1], [0, 0, 1, 1], [], []>} : vector<104x128xbf16>, vector<128x256xbf16>, vector<104x256xf32> -> vector<104x256xf32>
    %c0_9 = arith.constant 0 : index
    %c0_10 = arith.constant 0 : index
    %12 = vector.load %arg5[%c0_9, %c0_10] : memref<1x256xf32, #tpu.memory_space<vmem>>, vector<1x256xf32>
    %13 = vector.broadcast %12 : vector<1x256xf32> to vector<104x256xf32>
    %14 = arith.addf %11, %13 : vector<104x256xf32>
    %cst_11 = arith.constant dense<0.000000e+00> : vector<104xf32>
    %15 = vector.multi_reduction <add>, %14, %cst_11 [1] : vector<104x256xf32> to vector<104xf32>
    %16 = vector.shape_cast %15 : vector<104xf32> to vector<104x1xf32>
    %cst_12 = arith.constant 2.560000e+02 : f32
    %17 = vector.broadcast %cst_12 : f32 to vector<104x1xf32>
    %18 = arith.divf %16, %17 : vector<104x1xf32>
    %19 = vector.broadcast %18 : vector<104x1xf32> to vector<104x256xf32>
    %20 = arith.subf %14, %19 : vector<104x256xf32>
    %21 = arith.mulf %20, %20 : vector<104x256xf32>
    %cst_13 = arith.constant dense<0.000000e+00> : vector<104xf32>
    %22 = vector.multi_reduction <add>, %21, %cst_13 [1] : vector<104x256xf32> to vector<104xf32>
    %23 = vector.shape_cast %22 : vector<104xf32> to vector<104x1xf32>
    %cst_14 = arith.constant 2.560000e+02 : f32
    %24 = vector.broadcast %cst_14 : f32 to vector<104x1xf32>
    %25 = arith.divf %23, %24 : vector<104x1xf32>
    %cst_15 = arith.constant 9.99999997E-7 : f32
    %26 = vector.broadcast %cst_15 : f32 to vector<104x1xf32>
    %27 = arith.addf %25, %26 : vector<104x1xf32>
    %28 = math.rsqrt %27 : vector<104x1xf32>
    %29 = vector.broadcast %28 : vector<104x1xf32> to vector<104x256xf32>
    %30 = arith.mulf %20, %29 : vector<104x256xf32>
    %c0_16 = arith.constant 0 : index
    %c0_17 = arith.constant 0 : index
    %31 = vector.load %arg6[%c0_16, %c0_17] : memref<1x256xf32, #tpu.memory_space<vmem>>, vector<1x256xf32>
    %32 = vector.broadcast %31 : vector<1x256xf32> to vector<104x256xf32>
    %33 = arith.mulf %30, %32 : vector<104x256xf32>
    %c0_18 = arith.constant 0 : index
    %c0_19 = arith.constant 0 : index
    %34 = vector.load %arg7[%c0_18, %c0_19] : memref<1x256xf32, #tpu.memory_space<vmem>>, vector<1x256xf32>
    %35 = vector.broadcast %34 : vector<1x256xf32> to vector<104x256xf32>
    %36 = arith.addf %33, %35 : vector<104x256xf32>
    %c0_20 = arith.constant 0 : index
    %c0_21 = arith.constant 0 : index
    %37 = vector.load %arg8[%c0_20, %c0_21] : memref<104x256xf32, #tpu.memory_space<vmem>>, vector<104x256xf32>
    tpu.vector_store %arg8[%c0_20, %c0_21], %36 {strides = array<i32>} : memref<104x256xf32, #tpu.memory_space<vmem>>, vector<104x256xf32>,
    return
  }
  func.func @transform_0(%arg0: i32) -> (i32, i32) {
    %c0_i32 = arith.constant 0 : i32
    %c0_i32_0 = arith.constant 0 : i32
    return %arg0, %c0_i32 : i32, i32
  }
  func.func @transform_1(%arg0: i32) -> (i32, i32) {
    %c0_i32 = arith.constant 0 : i32
    %c0_i32_0 = arith.constant 0 : i32
    %c0_i32_1 = arith.constant 0 : i32
    return %c0_i32, %c0_i32_0 : i32, i32
  }
  func.func @transform_2(%arg0: i32) -> (i32, i32) {
    %c0_i32 = arith.constant 0 : i32
    %c0_i32_0 = arith.constant 0 : i32
    %c0_i32_1 = arith.constant 0 : i32
    return %c0_i32, %c0_i32_0 : i32, i32
  }
  func.func @transform_3(%arg0: i32) -> (i32, i32) {
    %c0_i32 = arith.constant 0 : i32
    %c0_i32_0 = arith.constant 0 : i32
    %c0_i32_1 = arith.constant 0 : i32
    return %c0_i32, %c0_i32_0 : i32, i32
  }
  func.func @transform_4(%arg0: i32) -> (i32, i32) {
    %c0_i32 = arith.constant 0 : i32
    %c0_i32_0 = arith.constant 0 : i32
    %c0_i32_1 = arith.constant 0 : i32
    return %c0_i32, %c0_i32_0 : i32, i32
  }
  func.func @transform_5(%arg0: i32) -> (i32, i32) {
    %c0_i32 = arith.constant 0 : i32
    %c0_i32_0 = arith.constant 0 : i32
    %c0_i32_1 = arith.constant 0 : i32
    return %c0_i32, %c0_i32_0 : i32, i32
  }
  func.func @transform_6(%arg0: i32) -> (i32, i32) {
    %c0_i32 = arith.constant 0 : i32
    %c0_i32_0 = arith.constant 0 : i32
    %c0_i32_1 = arith.constant 0 : i32
    return %c0_i32, %c0_i32_0 : i32, i32
  }
  func.func @transform_7(%arg0: i32) -> (i32, i32) {
    %c0_i32 = arith.constant 0 : i32
    %c0_i32_0 = arith.constant 0 : i32
    return %arg0, %c0_i32 : i32, i32
  }
}

</mosaic_0001>

<bundles_post_ra>
// kernel: tpu_custom_call.1
= control target key start
LH: loop header
LB: loop body
LE: loop exit
PB: predicated region body
PF: predicated region fallthrough
CT: control target
= control target key end

     0   :  { %12 = vsyncpa [#allocation3], 0  ;;  %s2034_s0 = inlined_call_operand.vmem [shape: f32[200,64], index: 0, kind: input, shape index: {}]   ;;  %s2035_s1 = inlined_call_operand.vmem [shape: bf16[64,128], index: 1, kind: input, shape index: {}]   ;;  %s2036_s2 = inlined_call_operand.vmem [shape: f32[1,128], index: 2, kind: input, shape index: {}]   ;;  %s2037_s3 = inlined_call_operand.vmem [shape: bf16[128,256], index: 3, kind: input, shape index: {}]   ;;  %s2038_s4 = inlined_call_operand.vmem [shape: f32[1,256], index: 4, kind: input, shape index: {}]   ;;  %s2039_s5 = inlined_call_operand.vmem [shape: f32[1,256], index: 5, kind: input, shape index: {}]   ;;  %s2040_s6 = inlined_call_operand.vmem [shape: f32[1,256], index: 6, kind: input, shape index: {}]   ;;  %s2041_s7 = inlined_call_operand.hbm [shape: f32[200,256], index: 7, kind: output, shape index: {}]  }
   0x1   :  { %14 = vsyncpa [#allocation3 + $0x1], 0  ;;  %s1416_s24 = smov 0   ;;  %s1418_s25 = smov 0  }
   0x2   :  { %s1420_s26 = smov 0   ;;  %s1422_s27 = smov 0  }
   0x3 LB: > { %s1437_s28 = sadd.s32 4294967295, %s1368_s27   ;;  %s1099_s29 = sadd.s32 4294967294, %s1368_s27   ;;  %s1368_s27 = sphi %s1422_s27, %s2047_s27   ;;  %s1364_s26 = sphi %s1420_s26, %s2046_s26   ;;  %s1360_s25 = sphi %s1418_s25, %s2045_s25   ;;  %s1356_s24 = sphi %s1416_s24, %s2044_s24  }
   0x4   : > { %s1441_s30 = sadd.s32 1, %s1368_s27   ;;  %s179_s8 = sadd.s32 1, %s1364_s26 }
   0x5   : > { %s176_s9 = ssub.s32 %s1368_s27, %s1441_s30  ;;  %p189_p0 = scmp.ne.s32.totalorder %s1364_s26, %s1360_s25 }
   0x6   : > { %p177_p1 = scmp.eq.s32.totalorder %s176_s9, 0  ;;  %p190_p2 = scmp.eq.s32.totalorder %s1437_s28, 1 }
   0x7   : > { %p195_p3 = scmp.ne.s32.totalorder %s1360_s25, %s1356_s24  ;;  %p196_p4 = scmp.eq.s32.totalorder %s1099_s29, 1 }
   0x8   : > { %s1452_s10 = scalar_select %p177_p1, %s1364_s26, %s179_s8  }
   0x9   : > { %p1454_p5 = por %p190_p2, %p189_p0  ;;  %p1458_p6 = por %p196_p4, %p195_p3 }
   0xa   : > { %p1102_p7 = scmp.ge.s32.totalorder %s1368_s27, 1  ;;  %p249_p8 = scmp.lt.s32.totalorder %s1368_s27, 3 }
   0xc   : > { %p250_p9 = pnand %p1102_p7, %p249_p8 }
   0xd   : > { %v1252_v0 = vld [vmem:[%s2035_s1] sm:$0xff] (!%p250_p9)   ;;  %v1370_v1 = vmov (!%p250_p9), 0.0   ;;  %v1253_v2 = vld [vmem:[%s2035_s1 + $0x8] sm:$0xff] (!%p250_p9)   ;;  %vm1371_vm0 = vmmov (!%p250_p9), 0   ;;  %s1474_s17 = smul.u32 (!%p250_p9), 13, %s1437_s28  ;;  %v1254_v4 = vld [vmem:[%s2035_s1 + $0x10] sm:$0xff] (!%p250_p9)  }
   0xe   : > { %253 = sbr.rel (%p250_p9) target bundleno = 857 (0x359), region = 48  ;;  %1156 = vmatprep.subr.bf16.mxu0 (!%p250_p9), %v1370_v1  ;;  %1164 = vmatprep.mubr.msk.bf16.mxu0 (!%p250_p9), %vm1371_vm0, %v1370_v1  ;;  %v1258_v3 = vld [vmem:[%s2037_s3 + $0x4] ss:$8 sps:$4 sm:$0xff] (!%p250_p9)   ;;  %v1256_v5 = vld [vmem:[%s2037_s3] ss:$8 sps:$4 sm:$0xff] (!%p250_p9)   ;;  %v1255_v7 = vld [vmem:[%s2035_s1 + $0x18] sm:$0xff] (!%p250_p9)  }
   0xf   : > { %1157 = vmatpush3.bf16.msra.mxu0 (!%p250_p9), %v1252_v0  ;;  %p290_p10 = scmp.lt.s32.totalorder (!%p250_p9), %s1474_s17, 24  ;;  %v1261_v6 = vld [vmem:[%s2037_s3 + $0x14] ss:$8 sps:$4 sm:$0xff] (!%p250_p9)   ;;  %1192 = vmatprep.subr.bf16.mxu1 (!%p250_p9), %v1258_v3  ;;  %v1259_v10 = vld [vmem:[%s2037_s3 + $0x10] ss:$8 sps:$4 sm:$0xff] (!%p250_p9)   ;;  %vm365_vm1 = vcmask (!%p250_p9), 523264  }
  0x10   : > { %1158 = vmatprep.subr.bf16.mxu0 (!%p250_p9), %v1370_v1  ;;  %1200 = vmatpush1.bf16.msra.mxu1 (!%p250_p9), %v1256_v5  ;;  %v1264_v11 = vld [vmem:[%s2037_s3 + $0x24] ss:$8 sps:$4 sm:$0xff] (!%p250_p9)   ;;  %v1262_v13 = vld [vmem:[%s2037_s3 + $0x20] ss:$8 sps:$4 sm:$0xff] (!%p250_p9)   ;;  %v1267_v14 = vld [vmem:[%s2037_s3 + $0x34] ss:$8 sps:$4 sm:$0xff] (!%p250_p9)  }
  0x11   : > { %1193 = vmatprep.subr.bf16.mxu1 (!%p250_p9), %v1261_v6  ;;  %v1265_v17 = vld [vmem:[%s2037_s3 + $0x30] ss:$8 sps:$4 sm:$0xff] (!%p250_p9)   ;;  %v1270_v18 = vld [vmem:[%s2037_s3 + $0x44] ss:$8 sps:$4 sm:$0xff] (!%p250_p9)   ;;  %v1268_v20 = vld [vmem:[%s2037_s3 + $0x40] ss:$8 sps:$4 sm:$0xff] (!%p250_p9)  }
  0x12   : > { %v1273_v21 = vld [vmem:[%s2037_s3 + $0x54] ss:$8 sps:$4 sm:$0xff] (!%p250_p9)   ;;  %v1271_v24 = vld [vmem:[%s2037_s3 + $0x50] ss:$8 sps:$4 sm:$0xff] (!%p250_p9)   ;;  %v1276_v37 = vld [vmem:[%s2037_s3 + $0x64] ss:$8 sps:$4 sm:$0xff] (!%p250_p9)  }
  0x13   : > { %1159 = vmatpush3.bf16.msra.mxu0 (!%p250_p9), %v1253_v2  ;;  %v1274_v38 = vld [vmem:[%s2037_s3 + $0x60] ss:$8 sps:$4 sm:$0xff] (!%p250_p9)   ;;  %v1279_v39 = vld [vmem:[%s2037_s3 + $0x74] ss:$8 sps:$4 sm:$0xff] (!%p250_p9)   ;;  %v1277_v40 = vld [vmem:[%s2037_s3 + $0x70] ss:$8 sps:$4 sm:$0xff] (!%p250_p9)  }
  0x14   : > { %1160 = vmatprep.subr.bf16.mxu0 (!%p250_p9), %v1370_v1  ;;  %1201 = vmatpush1.bf16.msra.mxu1 (!%p250_p9), %v1259_v10  ;;  %v1372_v41 = vmov (!%p250_p9), 0   ;;  %v1577_v42 = vld [vmem:[%s2036_s2] ss:$0 sm:$0xff] (!%p250_p9)  ;;  %s282_s8 = sand.u32 (!%p250_p9), 1, %s1360_s25  }
  0x15   : > { %s291_s22 = scalar_select %p290_p10, %s1474_s17, 24  ;;  %1194 = vmatprep.subr.bf16.mxu1 %v1264_v11  ;;  %645 = vmatprep.mubr.bf16.mxu1 %v1372_v41 }
  0x16   : > { %s1208_s16 = smul.u32 208, %s282_s8  ;;  %s1024_s20 = ssub.s32 (%p1454_p5), 25, %s1474_s17 }
  0x17   : > { %s1103_s13 = sshll.u32 %s291_s22, 3  ;;  %1161 = vmatpush3.bf16.msra.mxu0 %v1254_v4  ;;  %p1025_p11 = scmp.lt.s32.totalorder (%p1454_p5), %s1024_s20, 13 }
  0x18   : > { %s1498_s19 = scalar_lea.vmem %s2034_s0, %s1103_s13  ;;  %1162 = vmatprep.subr.bf16.mxu0 %v1370_v1  ;;  %1202 = vmatpush1.bf16.msra.mxu1 %v1262_v13  ;;  %s1873_s18 = scalar_lea.vmem [#allocation2], %s1208_s16 }
  0x19   : > { %v306_v8 = vld [vmem:[%s1498_s19] sm:$0xff]  ;;  %v307_v9 = vld [vmem:[%s1498_s19 + $0x8] sm:$0xff]  ;;  %1195 = vmatprep.subr.bf16.mxu1 %v1267_v14  ;;  %v308_v15 = vld [vmem:[%s1498_s19 + $0x10] sm:$0xff] }
  0x1a   : > { %v319_v12 = vpack.c.bf16 %v307_v9, %v306_v8  ;;  %v309_v16 = vld [vmem:[%s1498_s19 + $0x18] sm:$0xff]  ;;  %v310_v22 = vld [vmem:[%s1498_s19 + $0x20] sm:$0xff]  ;;  %v311_v23 = vld [vmem:[%s1498_s19 + $0x28] sm:$0xff] }
  0x1b   : > { %1163 = vmatpush3.bf16.msra.mxu0 %v1255_v7  ;;  %v320_v19 = vpack.c.bf16 %v309_v16, %v308_v15  ;;  %v321_v25 = vpack.c.bf16 %v311_v23, %v310_v22  ;;  %v312_v26 = vld [vmem:[%s1498_s19 + $0x30] sm:$0xff]  ;;  %v313_v27 = vld [vmem:[%s1498_s19 + $0x38] sm:$0xff]  ;;  %v314_v29 = vld [vmem:[%s1498_s19 + $0x40] sm:$0xff] }
  0x1c   : > { %603 = vmatprep.subr.bf16.mxu0 %v1258_v3  ;;  %1203 = vmatpush1.bf16.msra.mxu1 %v1265_v17  ;;  %v322_v28 = vpack.c.bf16 %v313_v27, %v312_v26  ;;  %v315_v30 = vld [vmem:[%s1498_s19 + $0x48] sm:$0xff]  ;;  %v316_v32 = vld [vmem:[%s1498_s19 + $0x50] sm:$0xff]  ;;  %v317_v33 = vld [vmem:[%s1498_s19 + $0x58] sm:$0xff] }
  0x1d   : > { %1196 = vmatprep.subr.bf16.mxu1 %v1270_v18  ;;  %v323_v31 = vpack.c.bf16 %v315_v30, %v314_v29  ;;  %v324_v34 = vpack.c.bf16 %v317_v33, %v316_v32  ;;  %v318_v35 = vld [vmem:[%s1498_s19 + $0x60] sm:$0xff]  ;;  %s1973_s19 = scalar_lea.sflag [#allocation3], %s282_s8 }
  0x1e   : > { %1165 = vmatmul.mubr.msk.bf16.vlgmr.msra.gmra.mrb[0].mxu0 %vm365_vm1, %v319_v12  ;;  %v325_v36 = vpack.c.bf16 %v318_v35, %v318_v35 }
  0x1f   : > { %1168 = vmatprep.mubr.msk.bf16.mxu0 %vm1371_vm0, %v1370_v1  ;;  %604 = vmatpush1.bf16.msra.mxu0 %v1256_v5 }
  0x20   : > { %605 = vmatprep.subr.bf16.mxu0 %v1261_v6  ;;  %1204 = vmatpush1.bf16.msra.mxu1 %v1268_v20 }
  0x21   : > { %1197 = vmatprep.subr.bf16.mxu1 %v1273_v21 }
  0x23   : > { %606 = vmatpush1.bf16.msra.mxu0 %v1259_v10 }
  0x24   : > { %607 = vmatprep.subr.bf16.mxu0 %v1264_v11  ;;  %1205 = vmatpush1.bf16.msra.mxu1 %v1271_v24 }
  0x25   : > { %1198 = vmatprep.subr.bf16.mxu1 %v1276_v37 }
  0x26   : > { %1169 = vmatmul.mubr.msk.bf16.gmra.mrb[4].mxu0 %vm365_vm1, %v320_v19 }
  0x27   : > { %1172 = vmatprep.mubr.msk.bf16.mxu0 %vm1371_vm0, %v1370_v1  ;;  %608 = vmatpush1.bf16.msra.mxu0 %v1262_v13 }
  0x28   : > { %609 = vmatprep.subr.bf16.mxu0 %v1267_v14  ;;  %1206 = vmatpush1.bf16.msra.mxu1 %v1274_v38 }
  0x29   : > { %1199 = vmatprep.subr.bf16.mxu1 %v1279_v39 }
  0x2b   : > { %610 = vmatpush1.bf16.msra.mxu0 %v1265_v17 }
  0x2c   : > { %611 = vmatprep.subr.bf16.mxu0 %v1270_v18  ;;  %1207 = vmatpush1.bf16.msra.mxu1 %v1277_v40 }
  0x2e   : > { %1173 = vmatmul.mubr.msk.bf16.gmra.mrb[8].mxu0 %vm365_vm1, %v321_v25 }
  0x2f   : > { %1176 = vmatprep.mubr.msk.bf16.mxu0 %vm1371_vm0, %v1370_v1  ;;  %612 = vmatpush1.bf16.msra.mxu0 %v1268_v20 }
  0x30   : > { %613 = vmatprep.subr.bf16.mxu0 %v1273_v21 }
  0x33   : > { %614 = vmatpush1.bf16.msra.mxu0 %v1271_v24 }
  0x34   : > { %615 = vmatprep.subr.bf16.mxu0 %v1276_v37 }
  0x36   : > { %1177 = vmatmul.mubr.msk.bf16.gmra.mrb[12].mxu0 %vm365_vm1, %v322_v28 }
  0x37   : > { %1180 = vmatprep.mubr.msk.bf16.mxu0 %vm1371_vm0, %v1370_v1  ;;  %616 = vmatpush1.bf16.msra.mxu0 %v1274_v38 }
  0x38   : > { %617 = vmatprep.subr.bf16.mxu0 %v1279_v39 }
  0x3b   : > { %618 = vmatpush1.bf16.msra.mxu0 %v1277_v40  ;;  %v513_v40 = vlaneseq }
  0x3e   : > { %1181 = vmatmul.mubr.msk.bf16.gmra.mrb[16].mxu0 %vm365_vm1, %v323_v31 }
  0x3f   : > { %1184 = vmatprep.mubr.msk.bf16.mxu0 %vm1371_vm0, %v1370_v1 }
  0x46   : > { %1185 = vmatmul.mubr.msk.bf16.gmra.mrb[20].mxu0 %vm365_vm1, %v324_v34 }
  0x47   : > { %1188 = vmatprep.mubr.msk.bf16.mxu0 %vm1371_vm0, %v1370_v1 }
  0x4e   : > { %1189 = vmatmul.mubr.msk.bf16.gmra.mrb[24].mxu0 %vm365_vm1, %v325_v36 }
  0x4f   : > { %635 = vmatprep.mubr.bf16.mxu0 %v1372_v41 }
  0xf1   : > { %v421_v43 = vpop.f32.mrb[0].mxu0 }
  0xf2   : > { %v422_v44 = vadd.f32 %v1577_v42, %v421_v43  ;;  %v1166_v45 = vpop.f32.mrb[1].mxu0  ;;  %v514_v43 = vshrl.u32 %v513_v40, 7 }
  0xf3   : > { %v424_v46 = vpop.f32.mrb[2].mxu0  ;;  %v511_v45 = vld [vmem:[%s2038_s4] sm:$0x3] }
  0xf4   : > { %v425_v47 = vadd.f32 %v1577_v42, %v424_v46  ;;  %v1167_v48 = vpop.f32.mrb[3].mxu0  ;;  %v475_v49 = vmax.f32 %v422_v44, 0.0  ;;  %v1597_v44 = vsub.s32 0, %v514_v43  ;;  %v1602_v46 = vsub.s32 1, %v514_v43 }
  0xf6   : > { %v476_v50 = vmax.f32 %v425_v47, 0.0  ;;  %v1608_v47 = vrot.slane %v511_v45, %v1602_v46 }
  0xf8   : > { %v488_v51 = vpack.c.bf16 %v476_v50, %v475_v49 }
  0xf9   : > { %v429_v52 = vpop.f32.mrb[4].mxu0 }
  0xfa   : > { %v430_v53 = vadd.f32 %v1577_v42, %v429_v52  ;;  %v1170_v54 = vpop.f32.mrb[5].mxu0  ;;  %636 = vmatmul.mubr.bf16.vlgmr.msra.gmra.mrb[28].mxu0 %v488_v51 }
  0xfb   : > { %v432_v55 = vpop.f32.mrb[6].mxu0 }
  0xfc   : > { %v433_v56 = vadd.f32 %v1577_v42, %v432_v55  ;;  %v1171_v57 = vpop.f32.mrb[7].mxu0  ;;  %v477_v58 = vmax.f32 %v430_v53, 0.0 }
  0xfe   : > { %v478_v59 = vmax.f32 %v433_v56, 0.0 }
 0x100   : > { %v489_v60 = vpack.c.bf16 %v478_v59, %v477_v58 }
 0x101   : > { %v437_v61 = vpop.f32.mrb[8].mxu0 }
 0x102   : > { %v438_v62 = vadd.f32 %v1577_v42, %v437_v61  ;;  %v1174_v63 = vpop.f32.mrb[9].mxu0  ;;  %646 = vmatmul.mubr.bf16.vlgmr.msra.gmra.mrb[0].mxu1 %v489_v60 }
 0x103   : > { %v440_v0 = vpop.f32.mrb[10].mxu0  ;;  %655 = vmatprep.mubr.bf16.mxu1 %v1372_v41 }
 0x104   : > { %v441_v1 = vadd.f32 %v1577_v42, %v440_v0  ;;  %v1175_v2 = vpop.f32.mrb[11].mxu0  ;;  %v479_v3 = vmax.f32 %v438_v62, 0.0 }
 0x106   : > { %v480_v4 = vmax.f32 %v441_v1, 0.0 }
 0x108   : > { %v490_v5 = vpack.c.bf16 %v480_v4, %v479_v3 }
 0x109   : > { %v445_v6 = vpop.f32.mrb[12].mxu0 }
 0x10a   : > { %v446_v7 = vadd.f32 %v1577_v42, %v445_v6  ;;  %v1178_v8 = vpop.f32.mrb[13].mxu0  ;;  %656 = vmatmul.mubr.bf16.gmra.mrb[4].mxu1 %v490_v5 }
 0x10b   : > { %v448_v9 = vpop.f32.mrb[14].mxu0  ;;  %665 = vmatprep.mubr.bf16.mxu1 %v1372_v41 }
 0x10c   : > { %v449_v10 = vadd.f32 %v1577_v42, %v448_v9  ;;  %v1179_v11 = vpop.f32.mrb[15].mxu0  ;;  %v481_v12 = vmax.f32 %v446_v7, 0.0 }
 0x10e   : > { %v482_v13 = vmax.f32 %v449_v10, 0.0 }
 0x110   : > { %v491_v14 = vpack.c.bf16 %v482_v13, %v481_v12 }
 0x111   : > { %v453_v15 = vpop.f32.mrb[16].mxu0 }
 0x112   : > { %v454_v16 = vadd.f32 %v1577_v42, %v453_v15  ;;  %v1182_v17 = vpop.f32.mrb[17].mxu0  ;;  %666 = vmatmul.mubr.bf16.gmra.mrb[8].mxu1 %v491_v14 }
 0x113   : > { %v456_v18 = vpop.f32.mrb[18].mxu0  ;;  %675 = vmatprep.mubr.bf16.mxu1 %v1372_v41 }
 0x114   : > { %v457_v19 = vadd.f32 %v1577_v42, %v456_v18  ;;  %v1183_v20 = vpop.f32.mrb[19].mxu0  ;;  %v483_v21 = vmax.f32 %v454_v16, 0.0 }
 0x116   : > { %v484_v22 = vmax.f32 %v457_v19, 0.0 }
 0x118   : > { %v492_v23 = vpack.c.bf16 %v484_v22, %v483_v21 }
 0x119   : > { %v461_v24 = vpop.f32.mrb[20].mxu0 }
 0x11a   : > { %v462_v25 = vadd.f32 %v1577_v42, %v461_v24  ;;  %v1186_v26 = vpop.f32.mrb[21].mxu0  ;;  %676 = vmatmul.mubr.bf16.gmra.mrb[12].mxu1 %v492_v23 }
 0x11b   : > { %v464_v27 = vpop.f32.mrb[22].mxu0  ;;  %685 = vmatprep.mubr.bf16.mxu1 %v1372_v41 }
 0x11c   : > { %v465_v28 = vadd.f32 %v1577_v42, %v464_v27  ;;  %v1187_v29 = vpop.f32.mrb[23].mxu0  ;;  %v485_v30 = vmax.f32 %v462_v25, 0.0 }
 0x11e   : > { %v486_v31 = vmax.f32 %v465_v28, 0.0 }
 0x120   : > { %v493_v32 = vpack.c.bf16 %v486_v31, %v485_v30 }
 0x121   : > { %v469_v33 = vpop.f32.mrb[24].mxu0 }
 0x122   : > { %v470_v34 = vadd.f32 %v1577_v42, %v469_v33  ;;  %v1190_v35 = vpop.f32.mrb[25].mxu0  ;;  %686 = vmatmul.mubr.bf16.gmra.mrb[16].mxu1 %v493_v32  ;;  %v1605_v42 = vrot.slane %v511_v45, %v1597_v44 }
 0x123   : > { %v472_v36 = vpop.f32.mrb[26].mxu0  ;;  %695 = vmatprep.mubr.bf16.mxu1 %v1372_v41 }
 0x124   : > { %v487_v37 = vmax.f32 %v470_v34, 0.0  ;;  %v1191_v38 = vpop.f32.mrb[27].mxu0 }
 0x126   : > { %v494_v39 = vpack.c.bf16 %v487_v37, %v487_v37 }
 0x12a   : > { %696 = vmatmul.mubr.bf16.gmra.mrb[20].mxu1 %v494_v39 }
 0x1cd   : > { %v637_v41 = vpop.f32.mrb[28].mxu0 }
 0x1ce   : > { %v1611_v48 = vadd.f32 %v637_v41, %v1605_v42  ;;  %v639_v49 = vpop.f32.mrb[29].mxu0 }
 0x1cf   : > { %v1614_v50 = vadd.f32 %v639_v49, %v1608_v47  ;;  %v641_v51 = vpop.f32.mrb[30].mxu0 }
 0x1d0   : > { %v643_v52 = vpop.f32.mrb[31].mxu0  ;;  %v1617_v53 = vadd.f32 %v641_v51, %v1605_v42 }
 0x1d1   : > { %v1620_v54 = vadd.f32 %v643_v52, %v1608_v47  ;;  %v704_v55 = vadd.f32 %v1614_v50, %v1611_v48 }
 0x1d3   : > { %705 = vadd.xlane.f32.xlu0 %v704_v55  ;;  %v707_v57 = vadd.f32 %v1620_v54, %v1617_v53 }
 0x1d5   : > { %v647_v56 = vpop.f32.mrb[0].mxu1 }
 0x1d6   : > { %v1627_v58 = vadd.f32 %v647_v56, %v1605_v42  ;;  %v649_v59 = vpop.f32.mrb[1].mxu1 }
 0x1d7   : > { %v1630_v60 = vadd.f32 %v649_v59, %v1608_v47  ;;  %v651_v61 = vpop.f32.mrb[2].mxu1  ;;  %708 = vadd.xlane.f32.xlu0 %v707_v57 }
 0x1d8   : > { %v653_v62 = vpop.f32.mrb[3].mxu1  ;;  %v1633_v63 = vadd.f32 %v651_v61, %v1605_v42 }
 0x1d9   : > { %v1636_v0 = vadd.f32 %v653_v62, %v1608_v47  ;;  %v710_v1 = vadd.f32 %v1630_v60, %v1627_v58 }
 0x1db   : > { %711 = vadd.xlane.f32.xlu1 %v710_v1  ;;  %v713_v3 = vadd.f32 %v1636_v0, %v1633_v63 }
 0x1dd   : > { %v657_v2 = vpop.f32.mrb[4].mxu1 }
 0x1de   : > { %v1643_v4 = vadd.f32 %v657_v2, %v1605_v42  ;;  %v659_v5 = vpop.f32.mrb[5].mxu1 }
 0x1df   : > { %v1646_v6 = vadd.f32 %v659_v5, %v1608_v47  ;;  %714 = vadd.xlane.f32.xlu1 %v713_v3  ;;  %v661_v7 = vpop.f32.mrb[6].mxu1 }
 0x1e0   : > { %v1649_v8 = vadd.f32 %v661_v7, %v1605_v42  ;;  %v663_v9 = vpop.f32.mrb[7].mxu1 }
 0x1e1   : > { %v1652_v10 = vadd.f32 %v663_v9, %v1608_v47  ;;  %v716_v11 = vadd.f32 %v1646_v6, %v1643_v4 }
 0x1e3   : > { %717 = vadd.xlane.f32.xlu0 %v716_v11  ;;  %v719_v12 = vadd.f32 %v1652_v10, %v1649_v8 }
 0x1e5   : > { %720 = vadd.xlane.f32.xlu1 %v719_v12  ;;  %v667_v13 = vpop.f32.mrb[8].mxu1 }
 0x1e6   : > { %v1659_v14 = vadd.f32 %v667_v13, %v1605_v42  ;;  %v669_v15 = vpop.f32.mrb[9].mxu1 }
 0x1e7   : > { %v1662_v16 = vadd.f32 %v669_v15, %v1608_v47  ;;  %v671_v17 = vpop.f32.mrb[10].mxu1 }
 0x1e8   : > { %v1665_v18 = vadd.f32 %v671_v17, %v1605_v42  ;;  %v673_v19 = vpop.f32.mrb[11].mxu1 }
 0x1e9   : > { %v1668_v20 = vadd.f32 %v673_v19, %v1608_v47  ;;  %v722_v21 = vadd.f32 %v1662_v16, %v1659_v14 }
 0x1eb   : > { %723 = vadd.xlane.f32.xlu0 %v722_v21  ;;  %v725_v22 = vadd.f32 %v1668_v20, %v1665_v18 }
 0x1ed   : > { %726 = vadd.xlane.f32.xlu1 %v725_v22  ;;  %v677_v23 = vpop.f32.mrb[12].mxu1 }
 0x1ee   : > { %v1675_v24 = vadd.f32 %v677_v23, %v1605_v42  ;;  %v679_v25 = vpop.f32.mrb[13].mxu1 }
 0x1ef   : > { %v1678_v26 = vadd.f32 %v679_v25, %v1608_v47  ;;  %v681_v27 = vpop.f32.mrb[14].mxu1 }
 0x1f0   : > { %v1681_v28 = vadd.f32 %v681_v27, %v1605_v42  ;;  %v683_v29 = vpop.f32.mrb[15].mxu1 }
 0x1f1   : > { %v1684_v30 = vadd.f32 %v683_v29, %v1608_v47  ;;  %v728_v31 = vadd.f32 %v1678_v26, %v1675_v24 }
 0x1f3   : > { %729 = vadd.xlane.f32.xlu0 %v728_v31  ;;  %v731_v32 = vadd.f32 %v1684_v30, %v1681_v28 }
 0x1f5   : > { %732 = vadd.xlane.f32.xlu1 %v731_v32  ;;  %v687_v33 = vpop.f32.mrb[16].mxu1 }
 0x1f6   : > { %v1691_v34 = vadd.f32 %v687_v33, %v1605_v42  ;;  %v689_v35 = vpop.f32.mrb[17].mxu1 }
 0x1f7   : > { %v1694_v36 = vadd.f32 %v689_v35, %v1608_v47  ;;  %v691_v37 = vpop.f32.mrb[18].mxu1 }
 0x1f8   : > { %v1697_v38 = vadd.f32 %v691_v37, %v1605_v42  ;;  %v693_v39 = vpop.f32.mrb[19].mxu1 }
 0x1f9   : > { %v1700_v40 = vadd.f32 %v693_v39, %v1608_v47  ;;  %v734_v43 = vadd.f32 %v1694_v36, %v1691_v34 }
 0x1fb   : > { %735 = vadd.xlane.f32.xlu0 %v734_v43  ;;  %v737_v45 = vadd.f32 %v1700_v40, %v1697_v38 }
 0x1fd   : > { %738 = vadd.xlane.f32.xlu1 %v737_v45  ;;  %v697_v41 = vpop.f32.mrb[20].mxu1 }
 0x1fe   : > { %v1707_v49 = vadd.f32 %v697_v41, %v1605_v42  ;;  %v699_v51 = vpop.f32.mrb[21].mxu1 }
 0x1ff   : > { %v1710_v52 = vadd.f32 %v699_v51, %v1608_v47  ;;  %v701_v55 = vpop.f32.mrb[22].mxu1 }
 0x200   : > { %v702_v56 = vpop.f32.mrb[23].mxu1 }
 0x201   : > { %v740_v57 = vadd.f32 %v1710_v52, %v1707_v49 }
 0x203   : > { %741 = vadd.xlane.f32.xlu0 %v740_v57 }
 0x260   : > { %v706_v59 = vpop.xlane.xlu0 %705 }
 0x261   : > { %v744_v61 = vmul.f32 0.00390625, %v706_v59 }
 0x263   : > { %v1715_v62 = vsub.f32 %v1611_v48, %v744_v61  ;;  %v1718_v1 = vsub.f32 %v1614_v50, %v744_v61 }
 0x264   : > { %v709_v42 = vpop.xlane.xlu0 %708 }
 0x265   : > { %v745_v2 = vmul.f32 0.00390625, %v709_v42  ;;  %v783_v47 = vmul.f32 %v1715_v62, %v1715_v62  ;;  %v784_v3 = vmul.f32 %v1718_v1, %v1718_v1 }
 0x267   : > { %v1725_v5 = vsub.f32 %v1617_v53, %v745_v2  ;;  %v1728_v7 = vsub.f32 %v1620_v54, %v745_v2  ;;  %v809_v9 = vadd.f32 %v784_v3, %v783_v47 }
 0x268   : > { %v712_v48 = vpop.xlane.xlu1 %711 }
 0x269   : > { %v746_v11 = vmul.f32 0.00390625, %v712_v48  ;;  %810 = vadd.xlane.f32.xlu1 %v809_v9  ;;  %v785_v50 = vmul.f32 %v1725_v5, %v1725_v5  ;;  %v786_v12 = vmul.f32 %v1728_v7, %v1728_v7 }
 0x26b   : > { %v1735_v13 = vsub.f32 %v1627_v58, %v746_v11  ;;  %v1738_v15 = vsub.f32 %v1630_v60, %v746_v11  ;;  %v812_v53 = vadd.f32 %v786_v12, %v785_v50 }
 0x26c   : > { %v715_v17 = vpop.xlane.xlu1 %714 }
 0x26d   : > { %v747_v54 = vmul.f32 0.00390625, %v715_v17  ;;  %813 = vadd.xlane.f32.xlu0 %v812_v53  ;;  %v787_v19 = vmul.f32 %v1735_v13, %v1735_v13  ;;  %v788_v21 = vmul.f32 %v1738_v15, %v1738_v15 }
 0x26f   : > { %v1745_v22 = vsub.f32 %v1633_v63, %v747_v54  ;;  %v1748_v23 = vsub.f32 %v1636_v0, %v747_v54  ;;  %v815_v58 = vadd.f32 %v788_v21, %v787_v19 }
 0x270   : > { %v718_v25 = vpop.xlane.xlu0 %717 }
 0x271   : > { %v748_v60 = vmul.f32 0.00390625, %v718_v25  ;;  %816 = vadd.xlane.f32.xlu1 %v815_v58  ;;  %v789_v27 = vmul.f32 %v1745_v22, %v1745_v22  ;;  %v790_v29 = vmul.f32 %v1748_v23, %v1748_v23 }
 0x272   : > { %v721_v31 = vpop.xlane.xlu1 %720 }
 0x273   : > { %v1755_v32 = vsub.f32 %v1643_v4, %v748_v60  ;;  %v1758_v63 = vsub.f32 %v1646_v6, %v748_v60  ;;  %v749_v33 = vmul.f32 0.00390625, %v721_v31  ;;  %v818_v0 = vadd.f32 %v790_v29, %v789_v27 }
 0x275   : > { %v1761_v35 = vsub.f32 %v1649_v8, %v749_v33  ;;  %v1764_v37 = vsub.f32 %v1652_v10, %v749_v33  ;;  %819 = vadd.xlane.f32.xlu0 %v818_v0  ;;  %v791_v39 = vmul.f32 %v1755_v32, %v1755_v32  ;;  %v792_v43 = vmul.f32 %v1758_v63, %v1758_v63 }
 0x277   : > { %v821_v4 = vadd.f32 %v792_v43, %v791_v39  ;;  %v793_v6 = vmul.f32 %v1761_v35, %v1761_v35  ;;  %v794_v45 = vmul.f32 %v1764_v37, %v1764_v37 }
 0x278   : > { %v724_v41 = vpop.xlane.xlu0 %723 }
 0x279   : > { %v750_v8 = vmul.f32 0.00390625, %v724_v41  ;;  %822 = vadd.xlane.f32.xlu1 %v821_v4  ;;  %v824_v51 = vadd.f32 %v794_v45, %v793_v6 }
 0x27a   : > { %v727_v10 = vpop.xlane.xlu1 %726 }
 0x27b   : > { %v1775_v55 = vsub.f32 %v1659_v14, %v750_v8  ;;  %v1778_v56 = vsub.f32 %v1662_v16, %v750_v8  ;;  %v751_v57 = vmul.f32 0.00390625, %v727_v10  ;;  %825 = vadd.xlane.f32.xlu0 %v824_v51 }
 0x27d   : > { %v1781_v59 = vsub.f32 %v1665_v18, %v751_v57  ;;  %v1784_v61 = vsub.f32 %v1668_v20, %v751_v57  ;;  %v795_v42 = vmul.f32 %v1775_v55, %v1775_v55  ;;  %v796_v2 = vmul.f32 %v1778_v56, %v1778_v56 }
 0x27f   : > { %v827_v47 = vadd.f32 %v796_v2, %v795_v42  ;;  %v797_v14 = vmul.f32 %v1781_v59, %v1781_v59  ;;  %v798_v16 = vmul.f32 %v1784_v61, %v1784_v61 }
 0x280   : > { %v730_v3 = vpop.xlane.xlu0 %729 }
 0x281   : > { %v752_v9 = vmul.f32 0.00390625, %v730_v3  ;;  %828 = vadd.xlane.f32.xlu1 %v827_v47  ;;  %v830_v18 = vadd.f32 %v798_v16, %v797_v14  ;;  %v913_v14 = vld [vmem:[%s2039_s5] sm:$0x3] }
 0x282   : > { %v733_v48 = vpop.xlane.xlu1 %732 }
 0x283   : > { %v1795_v20 = vsub.f32 %v1675_v24, %v752_v9  ;;  %v1798_v11 = vsub.f32 %v1678_v26, %v752_v9  ;;  %v753_v50 = vmul.f32 0.00390625, %v733_v48  ;;  %831 = vadd.xlane.f32.xlu0 %v830_v18  ;;  %v951_v9 = vld [vmem:[%s2040_s6] sm:$0x3]  ;;  %v1852_v48 = vrot.slane %v913_v14, %v1597_v44 }
 0x285   : > { %v1801_v12 = vsub.f32 %v1681_v28, %v753_v50  ;;  %v1804_v53 = vsub.f32 %v1684_v30, %v753_v50  ;;  %v799_v17 = vmul.f32 %v1795_v20, %v1795_v20  ;;  %v800_v54 = vmul.f32 %v1798_v11, %v1798_v11 }
 0x286   : > { %v1855_v50 = vrot.slane %v913_v14, %v1602_v46 }
 0x287   : > { %v833_v24 = vadd.f32 %v800_v54, %v799_v17  ;;  %v801_v26 = vmul.f32 %v1801_v12, %v1801_v12  ;;  %v802_v19 = vmul.f32 %v1804_v53, %v1804_v53 }
 0x288   : > { %v736_v21 = vpop.xlane.xlu0 %735 }
 0x289   : > { %v754_v28 = vmul.f32 0.00390625, %v736_v21  ;;  %834 = vadd.xlane.f32.xlu1 %v833_v24  ;;  %v836_v58 = vadd.f32 %v802_v19, %v801_v26  ;;  %v1860_v24 = vrot.slane %v951_v9, %v1597_v44  ;;  %v1863_v26 = vrot.slane %v951_v9, %v1602_v46 }
 0x28a   : > { %v739_v25 = vpop.xlane.xlu1 %738 }
 0x28b   : > { %v1815_v30 = vsub.f32 %v1691_v34, %v754_v28  ;;  %v1818_v60 = vsub.f32 %v1694_v36, %v754_v28  ;;  %v755_v27 = vmul.f32 0.00390625, %v739_v25  ;;  %837 = vadd.xlane.f32.xlu0 %v836_v58 }
 0x28d   : > { %v1822_v29 = vsub.f32 %v1697_v38, %v755_v27  ;;  %v1825_v31 = vsub.f32 %v1700_v40, %v755_v27  ;;  %v803_v33 = vmul.f32 %v1815_v30, %v1815_v30  ;;  %v804_v0 = vmul.f32 %v1818_v60, %v1818_v60 }
 0x28f   : > { %v839_v34 = vadd.f32 %v804_v0, %v803_v33  ;;  %v805_v36 = vmul.f32 %v1822_v29, %v1822_v29  ;;  %v806_v39 = vmul.f32 %v1825_v31, %v1825_v31 }
 0x290   : > { %v742_v43 = vpop.xlane.xlu0 %741 }
 0x291   : > { %v756_v4 = vmul.f32 0.00390625, %v742_v43  ;;  %840 = vadd.xlane.f32.xlu1 %v839_v34  ;;  %v842_v38 = vadd.f32 %v806_v39, %v805_v36 }
 0x293   : > { %v1836_v40 = vsub.f32 %v1707_v49, %v756_v4  ;;  %v1839_v6 = vsub.f32 %v1710_v52, %v756_v4  ;;  %843 = vadd.xlane.f32.xlu0 %v842_v38 }
 0x295   : > { %v807_v45 = vmul.f32 %v1836_v40, %v1836_v40  ;;  %v808_v41 = vmul.f32 %v1839_v6, %v1839_v6 }
 0x297   : > { %v845_v8 = vadd.f32 %v808_v41, %v807_v45 }
 0x299   : > { %846 = vadd.xlane.f32.xlu1 %v845_v8 }
 0x2f6   : > { %v811_v51 = vpop.xlane.xlu1 %810 }
 0x2f7   : > { %v848_v10 = vmul.f32 0.00390625, %v811_v51 }
 0x2f9   : > { %v861_v57 = vadd.f32 1e-06, %v848_v10 }
 0x2fa   : > { %v814_v42 = vpop.xlane.xlu0 %813 }
 0x2fb   : > { %1280 = vrsqrt.f32 %v861_v57  ;;  %v849_v49 = vmul.f32 0.00390625, %v814_v42 }
 0x2fd   : > { %v862_v2 = vadd.f32 1e-06, %v849_v49 }
 0x2fe   : > { %v817_v47 = vpop.xlane.xlu1 %816 }
 0x2ff   : > { %1282 = vrsqrt.f32 %v862_v2  ;;  %v850_v52 = vmul.f32 0.00390625, %v817_v47 }
 0x301   : > { %v863_v16 = vadd.f32 1e-06, %v850_v52 }
 0x302   : > { %v820_v3 = vpop.xlane.xlu0 %819 }
 0x303   : > { %1284 = vrsqrt.f32 %v863_v16  ;;  %v851_v18 = vmul.f32 0.00390625, %v820_v3 }
 0x305   : > { %v1281_v17 = vpop.eup %1280  ;;  %v864_v54 = vadd.f32 1e-06, %v851_v18 }
 0x306   : > { %v887_v19 = vmul.f32 %v1281_v17, %v1715_v62  ;;  %v888_v21 = vmul.f32 %v1281_v17, %v1718_v1  ;;  %v823_v28 = vpop.xlane.xlu1 %822 }
 0x307   : > { %1286 = vrsqrt.f32 %v864_v54  ;;  %v852_v58 = vmul.f32 0.00390625, %v823_v28 }
 0x308   : > { %v925_v25 = vmul.f32 %v1852_v48, %v887_v19  ;;  %v926_v27 = vmul.f32 %v1855_v50, %v888_v21  ;;  %v826_v33 = vpop.xlane.xlu0 %825 }
 0x309   : > { %v1283_v0 = vpop.eup %1282  ;;  %v865_v34 = vadd.f32 1e-06, %v852_v58  ;;  %v853_v36 = vmul.f32 0.00390625, %v826_v33 }
 0x30a   : > { %v963_v44 = vadd.f32 %v1860_v24, %v925_v25  ;;  %v964_v46 = vadd.f32 %v1863_v26, %v926_v27  ;;  %v889_v39 = vmul.f32 %v1283_v0, %v1725_v5  ;;  %v890_v62 = vmul.f32 %v1283_v0, %v1728_v7 }
 0x30b   : > { %1288 = vrsqrt.f32 %v865_v34  ;;  %v866_v1 = vadd.f32 1e-06, %v853_v36 }
 0x30c   : > { %989 = vst [vmem:[%s1873_s18] sm:$0xff] %v963_v44  ;;  %990 = vst [vmem:[%s1873_s18 + $0x8] sm:$0xff] %v964_v46  ;;  %v927_v43 = vmul.f32 %v1852_v48, %v889_v39  ;;  %v928_v4 = vmul.f32 %v1855_v50, %v890_v62 }
 0x30d   : > { %v1285_v38 = vpop.eup %1284  ;;  %1290 = vrsqrt.f32 %v866_v1 }
 0x30e   : > { %v965_v5 = vadd.f32 %v1860_v24, %v927_v43  ;;  %v966_v7 = vadd.f32 %v1863_v26, %v928_v4  ;;  %v891_v45 = vmul.f32 %v1285_v38, %v1735_v13  ;;  %v892_v41 = vmul.f32 %v1285_v38, %v1738_v15  ;;  %v829_v8 = vpop.xlane.xlu1 %828 }
 0x30f   : > { %v854_v51 = vmul.f32 0.00390625, %v829_v8 }
 0x310   : > { %991 = vst [vmem:[%s1873_s18 + $0x10] sm:$0xff] %v965_v5  ;;  %992 = vst [vmem:[%s1873_s18 + $0x18] sm:$0xff] %v966_v7  ;;  %v929_v10 = vmul.f32 %v1852_v48, %v891_v45  ;;  %v930_v57 = vmul.f32 %v1855_v50, %v892_v41  ;;  %v832_v42 = vpop.xlane.xlu0 %831 }
 0x311   : > { %v1287_v49 = vpop.eup %1286  ;;  %v867_v2 = vadd.f32 1e-06, %v854_v51  ;;  %v855_v47 = vmul.f32 0.00390625, %v832_v42 }
 0x312   : > { %v967_v52 = vadd.f32 %v1860_v24, %v929_v10  ;;  %v968_v13 = vadd.f32 %v1863_v26, %v930_v57  ;;  %v893_v15 = vmul.f32 %v1287_v49, %v1745_v22  ;;  %v894_v14 = vmul.f32 %v1287_v49, %v1748_v23 }
 0x313   : > { %1292 = vrsqrt.f32 %v867_v2  ;;  %v868_v16 = vadd.f32 1e-06, %v855_v47 }
 0x314   : > { %993 = vst [vmem:[%s1873_s18 + $0x20] sm:$0xff] %v967_v52  ;;  %994 = vst [vmem:[%s1873_s18 + $0x28] sm:$0xff] %v968_v13  ;;  %v931_v3 = vmul.f32 %v1852_v48, %v893_v15  ;;  %v932_v9 = vmul.f32 %v1855_v50, %v894_v14 }
 0x315   : > { %v1289_v18 = vpop.eup %1288  ;;  %1294 = vrsqrt.f32 %v868_v16 }
 0x316   : > { %v969_v17 = vadd.f32 %v1860_v24, %v931_v3  ;;  %v970_v54 = vadd.f32 %v1863_v26, %v932_v9  ;;  %v895_v22 = vmul.f32 %v1289_v18, %v1755_v32  ;;  %v896_v23 = vmul.f32 %v1289_v18, %v1758_v63  ;;  %v835_v19 = vpop.xlane.xlu1 %834 }
 0x317   : > { %v1291_v21 = vpop.eup %1290  ;;  %v856_v28 = vmul.f32 0.00390625, %v835_v19 }
 0x318   : > { %995 = vst [vmem:[%s1873_s18 + $0x30] sm:$0xff] %v969_v17  ;;  %996 = vst [vmem:[%s1873_s18 + $0x38] sm:$0xff] %v970_v54  ;;  %v933_v58 = vmul.f32 %v1852_v48, %v895_v22  ;;  %v934_v25 = vmul.f32 %v1855_v50, %v896_v23  ;;  %v897_v27 = vmul.f32 %v1291_v21, %v1761_v35  ;;  %v838_v0 = vpop.xlane.xlu0 %837 }
 0x319   : > { %v898_v33 = vmul.f32 %v1291_v21, %v1764_v37  ;;  %v869_v32 = vadd.f32 1e-06, %v856_v28  ;;  %v857_v63 = vmul.f32 0.00390625, %v838_v0 }
 0x31a   : > { %v971_v34 = vadd.f32 %v1860_v24, %v933_v58  ;;  %v972_v36 = vadd.f32 %v1863_v26, %v934_v25  ;;  %v935_v44 = vmul.f32 %v1852_v48, %v897_v27 }
 0x31b   : > { %v936_v46 = vmul.f32 %v1855_v50, %v898_v33  ;;  %1296 = vrsqrt.f32 %v869_v32  ;;  %v870_v39 = vadd.f32 1e-06, %v857_v63 }
 0x31c   : > { %997 = vst [vmem:[%s1873_s18 + $0x40] sm:$0xff] %v971_v34  ;;  %998 = vst [vmem:[%s1873_s18 + $0x48] sm:$0xff] %v972_v36  ;;  %v973_v35 = vadd.f32 %v1860_v24, %v935_v44 }
 0x31d   : > { %v974_v37 = vadd.f32 %v1863_v26, %v936_v46  ;;  %v1293_v62 = vpop.eup %1292  ;;  %1298 = vrsqrt.f32 %v870_v39 }
 0x31e   : > { %999 = vst [vmem:[%s1873_s18 + $0x50] sm:$0xff] %v973_v35  ;;  %v899_v1 = vmul.f32 %v1293_v62, %v1775_v55  ;;  %v900_v43 = vmul.f32 %v1293_v62, %v1778_v56  ;;  %v841_v4 = vpop.xlane.xlu1 %840 }
 0x31f   : > { %1000 = vst [vmem:[%s1873_s18 + $0x58] sm:$0xff] %v974_v37  ;;  %v1295_v38 = vpop.eup %1294  ;;  %v858_v5 = vmul.f32 0.00390625, %v841_v4 }
 0x320   : > { %v937_v7 = vmul.f32 %v1852_v48, %v899_v1  ;;  %v938_v45 = vmul.f32 %v1855_v50, %v900_v43  ;;  %v901_v41 = vmul.f32 %v1295_v38, %v1781_v59  ;;  %v902_v8 = vmul.f32 %v1295_v38, %v1784_v61  ;;  %v844_v51 = vpop.xlane.xlu0 %843 }
 0x321   : > { %v871_v10 = vadd.f32 1e-06, %v858_v5  ;;  %v859_v55 = vmul.f32 0.00390625, %v844_v51 }
 0x322   : > { %v975_v56 = vadd.f32 %v1860_v24, %v937_v7  ;;  %v976_v57 = vadd.f32 %v1863_v26, %v938_v45  ;;  %v939_v42 = vmul.f32 %v1852_v48, %v901_v41  ;;  %v940_v49 = vmul.f32 %v1855_v50, %v902_v8 }
 0x323   : > { %1300 = vrsqrt.f32 %v871_v10  ;;  %v872_v2 = vadd.f32 1e-06, %v859_v55 }
 0x324   : > { %1001 = vst [vmem:[%s1873_s18 + $0x60] sm:$0xff] %v975_v56  ;;  %1002 = vst [vmem:[%s1873_s18 + $0x68] sm:$0xff] %v976_v57  ;;  %v977_v59 = vadd.f32 %v1860_v24, %v939_v42  ;;  %v978_v61 = vadd.f32 %v1863_v26, %v940_v49 }
 0x325   : > { %v1297_v47 = vpop.eup %1296  ;;  %1302 = vrsqrt.f32 %v872_v2 }
 0x326   : > { %1003 = vst [vmem:[%s1873_s18 + $0x70] sm:$0xff] %v977_v59  ;;  %1004 = vst [vmem:[%s1873_s18 + $0x78] sm:$0xff] %v978_v61  ;;  %v903_v52 = vmul.f32 %v1297_v47, %v1795_v20  ;;  %v904_v13 = vmul.f32 %v1297_v47, %v1798_v11  ;;  %v847_v15 = vpop.xlane.xlu1 %846 }
 0x327   : > { %v1299_v14 = vpop.eup %1298  ;;  %v860_v16 = vmul.f32 0.00390625, %v847_v15 }
 0x328   : > { %v941_v3 = vmul.f32 %v1852_v48, %v903_v52  ;;  %v942_v9 = vmul.f32 %v1855_v50, %v904_v13  ;;  %v905_v18 = vmul.f32 %v1299_v14, %v1801_v12  ;;  %v906_v17 = vmul.f32 %v1299_v14, %v1804_v53 }
 0x329   : > { %v873_v54 = vadd.f32 1e-06, %v860_v16 }
 0x32a   : > { %v979_v22 = vadd.f32 %v1860_v24, %v941_v3  ;;  %v980_v20 = vadd.f32 %v1863_v26, %v942_v9  ;;  %v943_v11 = vmul.f32 %v1852_v48, %v905_v18  ;;  %v944_v23 = vmul.f32 %v1855_v50, %v906_v17 }
 0x32b   : > { %1304 = vrsqrt.f32 %v873_v54 }
 0x32c   : > { %1005 = vst [vmem:[%s1873_s18 + $0x80] sm:$0xff] %v979_v22  ;;  %1006 = vst [vmem:[%s1873_s18 + $0x88] sm:$0xff] %v980_v20  ;;  %v981_v19 = vadd.f32 %v1860_v24, %v943_v11  ;;  %v982_v21 = vadd.f32 %v1863_v26, %v944_v23 }
 0x32d   : > { %v1301_v12 = vpop.eup %1300 }
 0x32e   : > { %1007 = vst [vmem:[%s1873_s18 + $0x90] sm:$0xff] %v981_v19  ;;  %1008 = vst [vmem:[%s1873_s18 + $0x98] sm:$0xff] %v982_v21  ;;  %v907_v53 = vmul.f32 %v1301_v12, %v1815_v30  ;;  %v908_v28 = vmul.f32 %v1301_v12, %v1818_v60 }
 0x32f   : > { %v1303_v58 = vpop.eup %1302 }
 0x330   : > { %v945_v25 = vmul.f32 %v1852_v48, %v907_v53  ;;  %v946_v27 = vmul.f32 %v1855_v50, %v908_v28  ;;  %v909_v33 = vmul.f32 %v1303_v58, %v1822_v29  ;;  %v910_v0 = vmul.f32 %v1303_v58, %v1825_v31 }
 0x332   : > { %v983_v32 = vadd.f32 %v1860_v24, %v945_v25  ;;  %v984_v63 = vadd.f32 %v1863_v26, %v946_v27  ;;  %v947_v30 = vmul.f32 %v1852_v48, %v909_v33  ;;  %v948_v60 = vmul.f32 %v1855_v50, %v910_v0 }
 0x334   : > { %1009 = vst [vmem:[%s1873_s18 + $0xa0] sm:$0xff] %v983_v32  ;;  %1010 = vst [vmem:[%s1873_s18 + $0xa8] sm:$0xff] %v984_v63  ;;  %v985_v34 = vadd.f32 %v1860_v24, %v947_v30  ;;  %v986_v36 = vadd.f32 %v1863_v26, %v948_v60 }
 0x335   : > { %v1305_v29 = vpop.eup %1304 }
 0x336   : > { %1011 = vst [vmem:[%s1873_s18 + $0xb0] sm:$0xff] %v985_v34  ;;  %1012 = vst [vmem:[%s1873_s18 + $0xb8] sm:$0xff] %v986_v36  ;;  %v911_v31 = vmul.f32 %v1305_v29, %v1836_v40  ;;  %v912_v44 = vmul.f32 %v1305_v29, %v1839_v6  ;;  %1022 = sbr.rel (!%p1454_p5) target bundleno = 857 (0x359), region = 52 }
 0x338   : > { %v949_v46 = vmul.f32 %v1852_v48, %v911_v31  ;;  %v950_v39 = vmul.f32 %v1855_v50, %v912_v44 }
 0x33a   : > { %v987_v35 = vadd.f32 %v1860_v24, %v949_v46  ;;  %v988_v37 = vadd.f32 %v1863_v26, %v950_v39 }
 0x33c   : > { %1013 = vst [vmem:[%s1873_s18 + $0xc0] sm:$0xff] %v987_v35  ;;  %1014 = vst [vmem:[%s1873_s18 + $0xc8] sm:$0xff] %v988_v37 }
 0x33d   : > { %s2049_s20 = smov (!%p1025_p11, %s1024_s20), 13 }
 0x33e   : > { %s1978_s21 = sshll.u32 %s2049_s20, 8 }
 0x33f   : > { %s1030_s22 = ssub.s32 3328, %s1978_s21 }
 0x340   : > { %1031 = vsyncadd %s1973_s19, %s1030_s22  ;;  %p1134_p12 = scmp.ne.s32.totalorder %s1978_s21, 0  ;;  %s1144_s23 = smul.u32 3328, %s1437_s28 }
 0x341   : > { %s1037_s29 = sshll.u32 %s1873_s18, 4  ;;  %s1373_s13 = smov [#allocation2]   ;;  %s1990_s29 = int_to_ptr.vmem [resolvable:$true] %s1037_s29 }
 0x342   : > { %s1988_s9 = scalar_lea.hbm %s2041_s7, %s1144_s23  ;;  %s1306_s17 = scalar_lea.vmem %s1990_s29, %s1978_s21 }
 0x343   : > { %p1307_p13 = scmp.ne.s32.totalorder %s1990_s29, %s1306_s17  ;;  %s1310_s14 = sshll.u32 %s1373_s13, 4  ;;  %s1311_s14 = int_to_ptr.vmem [resolvable:$false] %s1310_s14 }
 0x344   : > { %s1312_s28 = scalar_lea.vmem %s1311_s14, 6656  ;;  %p1313_p2 = scmp.lt.s32.totalorder %s1990_s29, %s1311_s14 }
 0x345   : > { %p1308_p0 = pnand %p1307_p13, %p1134_p12  ;;  %p1314_p3 = scmp.lt.s32.totalorder %s1312_s28, %s1306_s17 }
 0x347   : > { %p1309_p1 = pneg %p1308_p0  ;;  %p1315_p4 = por %p1314_p3, %p1313_p2 }
 0x349   : > { %p1316_p5 = pnand %p1315_p4, %p1309_p1 }
 0x34b   : > { %1319 = shalt.err (!%p1316_p5)
}
 0x34c   : > { %s1320_s15 = scalar_lea.hbm %s1988_s9, %s1978_s21  ;;  %s1324_s20 = scalar_lea.hbm %s2041_s7, 6400 }
 0x34d   : > { %p1321_p7 = scmp.ne.s32.totalorder %s1988_s9, %s1320_s15  ;;  %p1325_p10 = scmp.lt.u32.totalorder %s1988_s9, %s2041_s7 }
 0x34e   : > { %p1326_p11 = scmp.lt.u32.totalorder %s1324_s20, %s1320_s15  ;;  %p1328_p0 = scmp.lt.u32.totalorder %s1320_s15, %s1988_s9 }
 0x34f   : > { %p1322_p8 = pnand %p1321_p7, %p1134_p12 }
 0x350   : > { %p1327_p13 = por %p1326_p11, %p1325_p10 }
 0x351   : > { %p1323_p9 = pneg %p1322_p8 }
 0x352   : > { %p1329_p1 = por %p1328_p0, %p1327_p13 }
 0x354   : > { %p1330_p2 = pnand %p1329_p1, %p1323_p9 }
 0x356   : > { %1333 = shalt.err (!%p1330_p2)
}
 0x357   : > { %s1374_s11 = smov 256   ;;  %s1375_s8 = smov 16  }
 0x358   : > { %1043 = dma.vmem_to_hbm [thread:$0]  (%p1134_p12), %s1990_s29, %s1978_s21, %s1988_s9, %s1973_s19, %s1374_s11, %s1374_s11, %s1375_s8  }
 0x359 PF: > { %p1214_p3 = scmp.ge.s32.totalorder %s1368_s27, 2  ;;  %s1052_s17 = sand.u32 1, %s1356_s24  }
 0x35a   : > { %s1053_s13 = scalar_lea.sflag [#allocation3], %s1052_s17 }
 0x35b   : > { %p1211_p4 = pnand %p1214_p3, %p1458_p6 }
 0x35d   : > { %1351 = dma.done.wait (!%p1211_p4), %s1053_s13, 3328  }
 0x35e   : > { %1353 = vsyncadd (!%p1211_p4), %s1053_s13, 4294963968  ;;  %p17_p5 = scmp.ge.s32.totalorder %s1441_s30, 4   ;;  %s2044_s24 = smov %s1360_s25 }
 0x35f   : > { %s2045_s25 = smov %s1364_s26  ;;  %s2046_s26 = smov %s1452_s10 }
 0x360   : > { %s2047_s27 = smov %s1441_s30  ;;  %19 = sbr.rel (!%p17_p5) target bundleno = 3 (0x3), region = 83 }
 0x367   :  { %1058 = vsyncpa [#allocation3], 1 }
 0x368   :  { %1060 = vsyncpa [#allocation3 + $0x1], 1 }

</bundles_post_ra>
